<compile_context>
chip_gen: v6e
topology: v6e:2x2x1
jax: 0.10.0
libtpu: 0.0.40
codegen_flags: <defaults>
</compile_context>

<pallas_src>
import functools

import jax
import jax.numpy as jnp
from jax import lax
from jax.experimental import pallas as pl
from jax.experimental.pallas import tpu as pltpu


_MAX_ROWS_PER_STEP = 4096  # ~2 KB live temps/row at peak -> well under 32 MiB scoped VMEM


def _default_bf16_im2col():
    """bf16 elementwise im2col only where the VPU supports bf16 (v6e / v7x)."""
    try:
        kind = jax.devices()[0].device_kind.lower()
    except Exception:  # pragma: no cover - be conservative
        return False
    return ("v6" in kind) or ("v7" in kind)


def _pick_block_b(B, T):
    """Largest divisor of B with (block_b*T) % 8 == 0, capped so per-step rows stay small
    and (when B allows) grid_b >= 2 for DMA/compute pipelining + megacore sharding."""
    cap_b = max(1, _MAX_ROWS_PER_STEP // T)
    if B >= 2:
        cap_b = min(cap_b, max(1, B // 2))
    cap_b = min(cap_b, B)
    for d in range(cap_b, 0, -1):
        if B % d == 0 and (d * T) % 8 == 0:
            return d
    return B  # whole-batch block (block == full array dim is always a legal block shape)


def _smoother_kernel(x_ref, w1_ref, w2_ref, w3_ref, b_ref, o_ref, im_ref, *, T, im_dtype):
    M, cin = x_ref.shape

    # ---- Hoisted per-row sequence-boundary masks (shared by every tap of every layer) ----
    # Rows are ordered (b, t) with t fastest and T | M, so `row % T` is the in-sequence time.
    t_idx = lax.broadcasted_iota(jnp.int32, (M, 1), 0) % T
    masks = {s: jnp.logical_and(t_idx + s >= 0, t_idx + s < T) for s in (-2, -1, 1, 2)}

    def conv(h, w_ref, bias):
        """One 'same' Conv1d as a single MXU matmul, im2col built in the VMEM scratch.

        h:     (M, C) f32.
        w_ref: (K*C, Cout) bf16 VMEM ref, row index k*C + c  (== torch_w[co, c, k]).
        bias:  (1, Cout) f32.
        """
        C = h.shape[-1]
        KC = w_ref.shape[0]
        K = KC // C
        P = (K - 1) // 2

        hc = h.astype(im_dtype)                      # cast ONCE per layer, before the tap loop
        for k in range(K):                           # static unroll over taps
            s = k - P                                # tap k reads h[b, t + s, :]
            if s == 0:
                col = hc
            else:
                # XLU sublane rotate; wrapped / cross-sequence rows zeroed by the hoisted mask.
                shifted = pltpu.roll(hc, shift=(-s) % M, axis=0)
                col = jnp.where(masks[s], shifted, jnp.zeros_like(shifted))
            im_ref[:, k * C:(k + 1) * C] = col       # static lane-offset store into scratch

        im = im_ref[:, 0:KC]                         # (M, K*C)
        y = jnp.dot(im.astype(jnp.bfloat16), w_ref[...],
                    preferred_element_type=jnp.float32)   # bf16 x bf16 -> f32 acc
        return y + bias

    x = x_ref[...].astype(jnp.float32)                               # (M, Cin)
    h1 = jnp.maximum(conv(x, w1_ref, b_ref[0:1, :]), 0.0)            # conv1 (k=5,p=2) + ReLU
    # TODO(synk): nn.Dropout(0.1) is identity in eval mode; training-mode dropout not implemented.
    h2 = jnp.maximum(conv(h1, w2_ref, b_ref[1:2, :]), 0.0)           # conv2 (k=3,p=1) + ReLU
    h3 = conv(h2, w3_ref, b_ref[2:3, :cin])                          # conv3 (k=5,p=2)

    o_ref[...] = h3.astype(o_ref.dtype)


def trajectory_smoother(x, w1, b1, w2, b2, w3, b3, *, block_b=None, bf16_im2col=None):
    """x: (B, T, Cin) float32.

    Conv weights must be in (K, Cin, Cout) layout, i.e. PyTorch's nn.Conv1d weight
    (Cout, Cin, K) transposed with .permute(2, 1, 0):
        w1: (5, Cin, H), w2: (3, H, H), w3: (5, H, Cin); biases b1/b2: (H,), b3: (Cin,).
    Returns (B, T, Cin) in x.dtype.
    """
    B, T, Cin = x.shape
    K1, _, H = w1.shape
    K2 = w2.shape[0]
    K3 = w3.shape[0]

    if bf16_im2col is None:
        bf16_im2col = _default_bf16_im2col()
    im_dtype = jnp.bfloat16 if bf16_im2col else jnp.float32

    if block_b is None:
        block_b = _pick_block_b(B, T)
    assert B % block_b == 0, "block_b must divide B"
    grid_b = B // block_b
    Mb = block_b * T
    assert (Mb % 8 == 0) or (grid_b == 1), "block rows must be a multiple of 8 (or cover full M)"

    KC_max = max(K1 * Cin, K2 * H, K3 * H)

    # im2col weight layout (K*Cin, Cout); bf16 operands for the MXU (f32 accumulation in-kernel).
    w1f = w1.reshape(K1 * Cin, H).astype(jnp.bfloat16)
    w2f = w2.reshape(K2 * H, H).astype(jnp.bfloat16)
    w3f = w3.reshape(K3 * H, Cin).astype(jnp.bfloat16)

    # Pack all three biases into one f32 tile (single DMA / VMEM tile instead of three).
    b_pack = jnp.zeros((3, H), jnp.float32)
    b_pack = b_pack.at[0, :H].set(b1.reshape(-1).astype(jnp.float32))
    b_pack = b_pack.at[1, :H].set(b2.reshape(-1).astype(jnp.float32))
    b_pack = b_pack.at[2, :Cin].set(b3.reshape(-1).astype(jnp.float32))

    x_flat = x.reshape(B * T, Cin)        # merge batch & time into the matmul M dimension

    # Per-step VMEM footprint -> explicit vmem_limit (keeps v7x's 64 MiB physical VMEM safe).
    im_bytes = jnp.dtype(im_dtype).itemsize
    per_row = (2 * 2 * Cin * 4            # double-buffered input + output blocks (f32)
               + 2 * H * 4                # h1 / h2 f32 live activations
               + 2 * KC_max * im_bytes)   # im2col scratch + tap-temp headroom
    fixed = (w1f.size + w2f.size + w3f.size) * 2 * 2 + 3 * H * 4 * 2 + (2 << 20)
    vmem_limit = int(1.5 * Mb * per_row) + fixed
    vmem_limit = max(32 << 20, min(vmem_limit, 64 << 20))

    full = lambda a: pl.BlockSpec(a.shape, lambda i: (0,) * a.ndim)

    out_flat = pl.pallas_call(
        functools.partial(_smoother_kernel, T=T, im_dtype=im_dtype),
        out_shape=jax.ShapeDtypeStruct((B * T, Cin), x.dtype),
        grid_spec=pltpu.PrefetchScalarGridSpec(
            num_scalar_prefetch=0,
            grid=(grid_b,),
            in_specs=[
                pl.BlockSpec((Mb, Cin), lambda i: (i, 0)),
                full(w1f), full(w2f), full(w3f), full(b_pack),
            ],
            out_specs=pl.BlockSpec((Mb, Cin), lambda i: (i, 0)),
            scratch_shapes=[pltpu.VMEM((Mb, KC_max), im_dtype)],
        ),
        compiler_params=pltpu.CompilerParams(
            dimension_semantics=("parallel",),
            vmem_limit_bytes=vmem_limit),
    )(x_flat, w1f, w2f, w3f, b_pack)

    return out_flat.reshape(B, T, Cin)


def _reference(x, w1, b1, w2, b2, w3, b3):
    """Plain-JAX reference using lax.conv_general_dilated (NCT layout, like PyTorch)."""
    def conv(h_ntc, w_kio, b_o, pad):
        w_oik = jnp.transpose(w_kio, (2, 1, 0))               # -> torch (Cout, Cin, K)
        h_nct = jnp.transpose(h_ntc, (0, 2, 1))
        y = lax.conv_general_dilated(h_nct, w_oik, window_strides=(1,),
                                     padding=[(pad, pad)],
                                     dimension_numbers=("NCH", "OIH", "NCH"))
        y = y + b_o.reshape(1, -1, 1)
        return jnp.transpose(y, (0, 2, 1))

    h = jax.nn.relu(conv(x, w1, b1, 2))
    h = jax.nn.relu(conv(h, w2, b2, 1))
    return conv(h, w3, b3, 2)


if __name__ == "__main__":
    key = jax.random.PRNGKey(0)
    B, T = 2, 16
    Cin, H = 2, 32  # input_channels=2, hidden_channels=32

    ks = jax.random.split(key, 7)
    x = jax.random.normal(ks[0], (B, T, Cin), jnp.float32)

    # Conv weights in (K, Cin, Cout) layout (== torch weight.permute(2, 1, 0)).
    w1 = jax.random.normal(ks[1], (5, Cin, H), jnp.float32) * 0.2
    b1 = jax.random.normal(ks[2], (H,), jnp.float32) * 0.1
    w2 = jax.random.normal(ks[3], (3, H, H), jnp.float32) * 0.1
    b2 = jax.random.normal(ks[4], (H,), jnp.float32) * 0.1
    w3 = jax.random.normal(ks[5], (5, H, Cin), jnp.float32) * 0.1
    b3 = jax.random.normal(ks[6], (Cin,), jnp.float32) * 0.1

    out = trajectory_smoother(x, w1, b1, w2, b2, w3, b3)
    out = jax.block_until_ready(out)

    ref = _reference(x, w1, b1, w2, b2, w3, b3)
    assert out.shape == (B, T, Cin), out.shape
    # bf16 MXU operands with f32 accumulation -> slightly looser tolerance vs the f32 reference.
    assert jnp.allclose(out, ref, atol=5e-2, rtol=5e-2), "mismatch vs reference"

    print("KERNEL_OK")
</pallas_src>

<mosaic_0001>
module attributes {stable_mosaic.version = 11 : i64} {
  func.func @_smoother_kernel(%arg0: i32, %arg1: memref<16x2xf32, #tpu.memory_space<vmem>>, %arg2: memref<10x32xbf16, #tpu.memory_space<vmem>>, %arg3: memref<96x32xbf16, #tpu.memory_space<vmem>>, %arg4: memref<160x2xbf16, #tpu.memory_space<vmem>>, %arg5: memref<3x32xf32, #tpu.memory_space<vmem>>, %arg6: memref<16x2xf32, #tpu.memory_space<vmem>>, %arg7: memref<16x160xf32, #tpu.memory_space<vmem>>) attributes {dimension_semantics = [#tpu.dimension_semantics<parallel>], iteration_bounds = array<i64: 2>, scalar_prefetch = 0 : i64, scratch_operands = 1 : i64, tpu.core_type = #tpu.core_type<tc>, window_params = [{transform_indices = @transform_0, window_bounds = array<i64: 16, 2>}, {pipeline_mode = #tpu.pipeline_mode<synchronous>, transform_indices = @transform_1, window_bounds = array<i64: 10, 32>}, {pipeline_mode = #tpu.pipeline_mode<synchronous>, transform_indices = @transform_2, window_bounds = array<i64: 96, 32>}, {pipeline_mode = #tpu.pipeline_mode<synchronous>, transform_indices = @transform_3, window_bounds = array<i64: 160, 2>}, {pipeline_mode = #tpu.pipeline_mode<synchronous>, transform_indices = @transform_4, window_bounds = array<i64: 3, 32>}, {transform_indices = @transform_5, window_bounds = array<i64: 16, 2>}]} {
    %0 = tpu.iota {dimensions = array<i32: 0>} : vector<16x1xi32>
    %c16_i32 = arith.constant 16 : i32
    %c0_i32 = arith.constant 0 : i32
    %1 = arith.cmpi eq, %c16_i32, %c0_i32 : i32
    %c1_i32 = arith.constant 1 : i32
    %2 = arith.select %1, %c1_i32, %c16_i32 : i32
    %3 = vector.broadcast %2 : i32 to vector<16x1xi32>
    %4 = arith.remsi %0, %3 : vector<16x1xi32>
    %c0_i32_0 = arith.constant 0 : i32
    %5 = vector.broadcast %c0_i32_0 : i32 to vector<16x1xi32>
    %6 = arith.cmpi ne, %4, %5 : vector<16x1xi32>
    %c0_i32_1 = arith.constant 0 : i32
    %7 = vector.broadcast %c0_i32_1 : i32 to vector<16x1xi32>
    %8 = arith.cmpi slt, %4, %7 : vector<16x1xi32>
    %c0_i32_2 = arith.constant 0 : i32
    %9 = arith.cmpi slt, %2, %c0_i32_2 : i32
    %10 = vector.broadcast %9 : i1 to vector<16x1xi1>
    %11 = vector.broadcast %10 : vector<16x1xi1> to vector<16x1xi1>
    %12 = arith.xori %8, %11 : vector<16x1xi1>
    %13 = arith.andi %12, %6 : vector<16x1xi1>
    %14 = vector.broadcast %2 : i32 to vector<16x1xi32>
    %15 = arith.addi %4, %14 : vector<16x1xi32>
    %16 = arith.select %13, %15, %4 : vector<16x1xi1>, vector<16x1xi32>
    %c-2_i32 = arith.constant -2 : i32
    %17 = vector.broadcast %c-2_i32 : i32 to vector<16x1xi32>
    %18 = arith.addi %16, %17 : vector<16x1xi32>
    %c0_i32_3 = arith.constant 0 : i32
    %19 = vector.broadcast %c0_i32_3 : i32 to vector<16x1xi32>
    %20 = arith.cmpi sge, %18, %19 : vector<16x1xi32>
    %c-2_i32_4 = arith.constant -2 : i32
    %21 = vector.broadcast %c-2_i32_4 : i32 to vector<16x1xi32>
    %22 = arith.addi %16, %21 : vector<16x1xi32>
    %c16_i32_5 = arith.constant 16 : i32
    %23 = vector.broadcast %c16_i32_5 : i32 to vector<16x1xi32>
    %24 = arith.cmpi slt, %22, %23 : vector<16x1xi32>
    %25 = arith.andi %20, %24 : vector<16x1xi1>
    %c-1_i32 = arith.constant -1 : i32
    %26 = vector.broadcast %c-1_i32 : i32 to vector<16x1xi32>
    %27 = arith.addi %16, %26 : vector<16x1xi32>
    %c0_i32_6 = arith.constant 0 : i32
    %28 = vector.broadcast %c0_i32_6 : i32 to vector<16x1xi32>
    %29 = arith.cmpi sge, %27, %28 : vector<16x1xi32>
    %c-1_i32_7 = arith.constant -1 : i32
    %30 = vector.broadcast %c-1_i32_7 : i32 to vector<16x1xi32>
    %31 = arith.addi %16, %30 : vector<16x1xi32>
    %c16_i32_8 = arith.constant 16 : i32
    %32 = vector.broadcast %c16_i32_8 : i32 to vector<16x1xi32>
    %33 = arith.cmpi slt, %31, %32 : vector<16x1xi32>
    %34 = arith.andi %29, %33 : vector<16x1xi1>
    %c1_i32_9 = arith.constant 1 : i32
    %35 = vector.broadcast %c1_i32_9 : i32 to vector<16x1xi32>
    %36 = arith.addi %16, %35 : vector<16x1xi32>
    %c0_i32_10 = arith.constant 0 : i32
    %37 = vector.broadcast %c0_i32_10 : i32 to vector<16x1xi32>
    %38 = arith.cmpi sge, %36, %37 : vector<16x1xi32>
    %c1_i32_11 = arith.constant 1 : i32
    %39 = vector.broadcast %c1_i32_11 : i32 to vector<16x1xi32>
    %40 = arith.addi %16, %39 : vector<16x1xi32>
    %c16_i32_12 = arith.constant 16 : i32
    %41 = vector.broadcast %c16_i32_12 : i32 to vector<16x1xi32>
    %42 = arith.cmpi slt, %40, %41 : vector<16x1xi32>
    %43 = arith.andi %38, %42 : vector<16x1xi1>
    %c2_i32 = arith.constant 2 : i32
    %44 = vector.broadcast %c2_i32 : i32 to vector<16x1xi32>
    %45 = arith.addi %16, %44 : vector<16x1xi32>
    %c0_i32_13 = arith.constant 0 : i32
    %46 = vector.broadcast %c0_i32_13 : i32 to vector<16x1xi32>
    %47 = arith.cmpi sge, %45, %46 : vector<16x1xi32>
    %c2_i32_14 = arith.constant 2 : i32
    %48 = vector.broadcast %c2_i32_14 : i32 to vector<16x1xi32>
    %49 = arith.addi %16, %48 : vector<16x1xi32>
    %c16_i32_15 = arith.constant 16 : i32
    %50 = vector.broadcast %c16_i32_15 : i32 to vector<16x1xi32>
    %51 = arith.cmpi slt, %49, %50 : vector<16x1xi32>
    %52 = arith.andi %47, %51 : vector<16x1xi1>
    %c0 = arith.constant 0 : index
    %c0_16 = arith.constant 0 : index
    %53 = vector.load %arg1[%c0, %c0_16] : memref<16x2xf32, #tpu.memory_space<vmem>>, vector<16x2xf32>
    %c0_17 = arith.constant 0 : index
    %c0_18 = arith.constant 0 : index
    %54 = vector.load %arg5[%c0_17, %c0_18] : memref<3x32xf32, #tpu.memory_space<vmem>>, vector<1x32xf32>
    %c2_i32_19 = arith.constant 2 : i32
    %55 = tpu.dynamic_rotate %53 by %c2_i32_19 dim 0 : vector<16x2xf32>, i32 -> vector<16x2xf32>
    %cst = arith.constant 0.000000e+00 : f32
    %56 = vector.broadcast %cst : f32 to vector<16x2xf32>
    %57 = vector.shape_cast %25 : vector<16x1xi1> to vector<16x1xi1>
    %58 = vector.broadcast %57 : vector<16x1xi1> to vector<16x2xi1>
    %59 = arith.select %58, %55, %56 : vector<16x2xi1>, vector<16x2xf32>
    %c0_20 = arith.constant 0 : index
    %c0_21 = arith.constant 0 : index
    %60 = vector.load %arg7[%c0_20, %c0_21] : memref<16x160xf32, #tpu.memory_space<vmem>>, vector<16x2xf32>
    tpu.vector_store %arg7[%c0_20, %c0_21], %59 {strides = array<i32>} : memref<16x160xf32, #tpu.memory_space<vmem>>, vector<16x2xf32>,
    %c1_i32_22 = arith.constant 1 : i32
    %61 = tpu.dynamic_rotate %53 by %c1_i32_22 dim 0 : vector<16x2xf32>, i32 -> vector<16x2xf32>
    %cst_23 = arith.constant 0.000000e+00 : f32
    %62 = vector.broadcast %cst_23 : f32 to vector<16x2xf32>
    %63 = vector.shape_cast %34 : vector<16x1xi1> to vector<16x1xi1>
    %64 = vector.broadcast %63 : vector<16x1xi1> to vector<16x2xi1>
    %65 = arith.select %64, %61, %62 : vector<16x2xi1>, vector<16x2xf32>
    %c0_24 = arith.constant 0 : index
    %c2 = arith.constant 2 : index
    %66 = vector.load %arg7[%c0_24, %c2] : memref<16x160xf32, #tpu.memory_space<vmem>>, vector<16x2xf32>
    tpu.vector_store %arg7[%c0_24, %c2], %65 {strides = array<i32>} : memref<16x160xf32, #tpu.memory_space<vmem>>, vector<16x2xf32>,
    %c0_25 = arith.constant 0 : index
    %c4 = arith.constant 4 : index
    %67 = vector.load %arg7[%c0_25, %c4] : memref<16x160xf32, #tpu.memory_space<vmem>>, vector<16x2xf32>
    tpu.vector_store %arg7[%c0_25, %c4], %53 {strides = array<i32>} : memref<16x160xf32, #tpu.memory_space<vmem>>, vector<16x2xf32>,
    %c15_i32 = arith.constant 15 : i32
    %68 = tpu.dynamic_rotate %53 by %c15_i32 dim 0 : vector<16x2xf32>, i32 -> vector<16x2xf32>
    %cst_26 = arith.constant 0.000000e+00 : f32
    %69 = vector.broadcast %cst_26 : f32 to vector<16x2xf32>
    %70 = vector.shape_cast %43 : vector<16x1xi1> to vector<16x1xi1>
    %71 = vector.broadcast %70 : vector<16x1xi1> to vector<16x2xi1>
    %72 = arith.select %71, %68, %69 : vector<16x2xi1>, vector<16x2xf32>
    %c0_27 = arith.constant 0 : index
    %c6 = arith.constant 6 : index
    %73 = vector.load %arg7[%c0_27, %c6] : memref<16x160xf32, #tpu.memory_space<vmem>>, vector<16x2xf32>
    tpu.vector_store %arg7[%c0_27, %c6], %72 {strides = array<i32>} : memref<16x160xf32, #tpu.memory_space<vmem>>, vector<16x2xf32>,
    %c14_i32 = arith.constant 14 : i32
    %74 = tpu.dynamic_rotate %53 by %c14_i32 dim 0 : vector<16x2xf32>, i32 -> vector<16x2xf32>
    %cst_28 = arith.constant 0.000000e+00 : f32
    %75 = vector.broadcast %cst_28 : f32 to vector<16x2xf32>
    %76 = vector.shape_cast %52 : vector<16x1xi1> to vector<16x1xi1>
    %77 = vector.broadcast %76 : vector<16x1xi1> to vector<16x2xi1>
    %78 = arith.select %77, %74, %75 : vector<16x2xi1>, vector<16x2xf32>
    %c0_29 = arith.constant 0 : index
    %c8 = arith.constant 8 : index
    %79 = vector.load %arg7[%c0_29, %c8] : memref<16x160xf32, #tpu.memory_space<vmem>>, vector<16x2xf32>
    tpu.vector_store %arg7[%c0_29, %c8], %78 {strides = array<i32>} : memref<16x160xf32, #tpu.memory_space<vmem>>, vector<16x2xf32>,
    %c0_30 = arith.constant 0 : index
    %c0_31 = arith.constant 0 : index
    %80 = vector.load %arg7[%c0_30, %c0_31] : memref<16x160xf32, #tpu.memory_space<vmem>>, vector<16x10xf32>
    %81 = arith.truncf %80 : vector<16x10xf32> to vector<16x10xbf16>
    %c0_32 = arith.constant 0 : index
    %c0_33 = arith.constant 0 : index
    %82 = vector.load %arg2[%c0_32, %c0_33] : memref<10x32xbf16, #tpu.memory_space<vmem>>, vector<10x32xbf16>
    %cst_34 = arith.constant dense<0.000000e+00> : vector<16x32xf32>
    %83 = tpu.matmul %81, %82, %cst_34 {dimension_numbers = #tpu.dot_dimension_numbers<[1], [0], [0], [1], [0, 0, 1, 1], [], []>} : vector<16x10xbf16>, vector<10x32xbf16>, vector<16x32xf32> -> vector<16x32xf32>
    %84 = vector.broadcast %54 : vector<1x32xf32> to vector<16x32xf32>
    %85 = arith.addf %83, %84 : vector<16x32xf32>
    %cst_35 = arith.constant 0.000000e+00 : f32
    %86 = vector.broadcast %cst_35 : f32 to vector<16x32xf32>
    %87 = arith.maximumf %85, %86 : vector<16x32xf32>
    %c1 = arith.constant 1 : index
    %c0_36 = arith.constant 0 : index
    %88 = vector.load %arg5[%c1, %c0_36] : memref<3x32xf32, #tpu.memory_space<vmem>>, vector<1x32xf32>
    %c1_i32_37 = arith.constant 1 : i32
    %89 = tpu.dynamic_rotate %87 by %c1_i32_37 dim 0 : vector<16x32xf32>, i32 -> vector<16x32xf32>
    %cst_38 = arith.constant 0.000000e+00 : f32
    %90 = vector.broadcast %cst_38 : f32 to vector<16x32xf32>
    %91 = vector.shape_cast %34 : vector<16x1xi1> to vector<16x1xi1>
    %92 = vector.broadcast %91 : vector<16x1xi1> to vector<16x32xi1>
    %93 = arith.select %92, %89, %90 : vector<16x32xi1>, vector<16x32xf32>
    %c0_39 = arith.constant 0 : index
    %c0_40 = arith.constant 0 : index
    %94 = vector.load %arg7[%c0_39, %c0_40] : memref<16x160xf32, #tpu.memory_space<vmem>>, vector<16x32xf32>
    tpu.vector_store %arg7[%c0_39, %c0_40], %93 {strides = array<i32>} : memref<16x160xf32, #tpu.memory_space<vmem>>, vector<16x32xf32>,
    %c0_41 = arith.constant 0 : index
    %c32 = arith.constant 32 : index
    %95 = vector.load %arg7[%c0_41, %c32] : memref<16x160xf32, #tpu.memory_space<vmem>>, vector<16x32xf32>
    tpu.vector_store %arg7[%c0_41, %c32], %87 {strides = array<i32>} : memref<16x160xf32, #tpu.memory_space<vmem>>, vector<16x32xf32>,
    %c15_i32_42 = arith.constant 15 : i32
    %96 = tpu.dynamic_rotate %87 by %c15_i32_42 dim 0 : vector<16x32xf32>, i32 -> vector<16x32xf32>
    %cst_43 = arith.constant 0.000000e+00 : f32
    %97 = vector.broadcast %cst_43 : f32 to vector<16x32xf32>
    %98 = vector.shape_cast %43 : vector<16x1xi1> to vector<16x1xi1>
    %99 = vector.broadcast %98 : vector<16x1xi1> to vector<16x32xi1>
    %100 = arith.select %99, %96, %97 : vector<16x32xi1>, vector<16x32xf32>
    %c0_44 = arith.constant 0 : index
    %c64 = arith.constant 64 : index
    %101 = vector.load %arg7[%c0_44, %c64] : memref<16x160xf32, #tpu.memory_space<vmem>>, vector<16x32xf32>
    tpu.vector_store %arg7[%c0_44, %c64], %100 {strides = array<i32>} : memref<16x160xf32, #tpu.memory_space<vmem>>, vector<16x32xf32>,
    %c0_45 = arith.constant 0 : index
    %c0_46 = arith.constant 0 : index
    %102 = vector.load %arg7[%c0_45, %c0_46] : memref<16x160xf32, #tpu.memory_space<vmem>>, vector<16x96xf32>
    %103 = arith.truncf %102 : vector<16x96xf32> to vector<16x96xbf16>
    %c0_47 = arith.constant 0 : index
    %c0_48 = arith.constant 0 : index
    %104 = vector.load %arg3[%c0_47, %c0_48] : memref<96x32xbf16, #tpu.memory_space<vmem>>, vector<96x32xbf16>
    %cst_49 = arith.constant dense<0.000000e+00> : vector<16x32xf32>
    %105 = tpu.matmul %103, %104, %cst_49 {dimension_numbers = #tpu.dot_dimension_numbers<[1], [0], [0], [1], [0, 0, 1, 1], [], []>} : vector<16x96xbf16>, vector<96x32xbf16>, vector<16x32xf32> -> vector<16x32xf32>
    %106 = vector.broadcast %88 : vector<1x32xf32> to vector<16x32xf32>
    %107 = arith.addf %105, %106 : vector<16x32xf32>
    %cst_50 = arith.constant 0.000000e+00 : f32
    %108 = vector.broadcast %cst_50 : f32 to vector<16x32xf32>
    %109 = arith.maximumf %107, %108 : vector<16x32xf32>
    %c2_51 = arith.constant 2 : index
    %c0_52 = arith.constant 0 : index
    %110 = vector.load %arg5[%c2_51, %c0_52] : memref<3x32xf32, #tpu.memory_space<vmem>>, vector<1x2xf32>
    %c2_i32_53 = arith.constant 2 : i32
    %111 = tpu.dynamic_rotate %109 by %c2_i32_53 dim 0 : vector<16x32xf32>, i32 -> vector<16x32xf32>
    %cst_54 = arith.constant 0.000000e+00 : f32
    %112 = vector.broadcast %cst_54 : f32 to vector<16x32xf32>
    %113 = vector.shape_cast %25 : vector<16x1xi1> to vector<16x1xi1>
    %114 = vector.broadcast %113 : vector<16x1xi1> to vector<16x32xi1>
    %115 = arith.select %114, %111, %112 : vector<16x32xi1>, vector<16x32xf32>
    %c0_55 = arith.constant 0 : index
    %c0_56 = arith.constant 0 : index
    %116 = vector.load %arg7[%c0_55, %c0_56] : memref<16x160xf32, #tpu.memory_space<vmem>>, vector<16x32xf32>
    tpu.vector_store %arg7[%c0_55, %c0_56], %115 {strides = array<i32>} : memref<16x160xf32, #tpu.memory_space<vmem>>, vector<16x32xf32>,
    %c1_i32_57 = arith.constant 1 : i32
    %117 = tpu.dynamic_rotate %109 by %c1_i32_57 dim 0 : vector<16x32xf32>, i32 -> vector<16x32xf32>
    %cst_58 = arith.constant 0.000000e+00 : f32
    %118 = vector.broadcast %cst_58 : f32 to vector<16x32xf32>
    %119 = vector.shape_cast %34 : vector<16x1xi1> to vector<16x1xi1>
    %120 = vector.broadcast %119 : vector<16x1xi1> to vector<16x32xi1>
    %121 = arith.select %120, %117, %118 : vector<16x32xi1>, vector<16x32xf32>
    %c0_59 = arith.constant 0 : index
    %c32_60 = arith.constant 32 : index
    %122 = vector.load %arg7[%c0_59, %c32_60] : memref<16x160xf32, #tpu.memory_space<vmem>>, vector<16x32xf32>
    tpu.vector_store %arg7[%c0_59, %c32_60], %121 {strides = array<i32>} : memref<16x160xf32, #tpu.memory_space<vmem>>, vector<16x32xf32>,
    %c0_61 = arith.constant 0 : index
    %c64_62 = arith.constant 64 : index
    %123 = vector.load %arg7[%c0_61, %c64_62] : memref<16x160xf32, #tpu.memory_space<vmem>>, vector<16x32xf32>
    tpu.vector_store %arg7[%c0_61, %c64_62], %109 {strides = array<i32>} : memref<16x160xf32, #tpu.memory_space<vmem>>, vector<16x32xf32>,
    %c15_i32_63 = arith.constant 15 : i32
    %124 = tpu.dynamic_rotate %109 by %c15_i32_63 dim 0 : vector<16x32xf32>, i32 -> vector<16x32xf32>
    %cst_64 = arith.constant 0.000000e+00 : f32
    %125 = vector.broadcast %cst_64 : f32 to vector<16x32xf32>
    %126 = vector.shape_cast %43 : vector<16x1xi1> to vector<16x1xi1>
    %127 = vector.broadcast %126 : vector<16x1xi1> to vector<16x32xi1>
    %128 = arith.select %127, %124, %125 : vector<16x32xi1>, vector<16x32xf32>
    %c0_65 = arith.constant 0 : index
    %c96 = arith.constant 96 : index
    %129 = vector.load %arg7[%c0_65, %c96] : memref<16x160xf32, #tpu.memory_space<vmem>>, vector<16x32xf32>
    tpu.vector_store %arg7[%c0_65, %c96], %128 {strides = array<i32>} : memref<16x160xf32, #tpu.memory_space<vmem>>, vector<16x32xf32>,
    %c14_i32_66 = arith.constant 14 : i32
    %130 = tpu.dynamic_rotate %109 by %c14_i32_66 dim 0 : vector<16x32xf32>, i32 -> vector<16x32xf32>
    %cst_67 = arith.constant 0.000000e+00 : f32
    %131 = vector.broadcast %cst_67 : f32 to vector<16x32xf32>
    %132 = vector.shape_cast %52 : vector<16x1xi1> to vector<16x1xi1>
    %133 = vector.broadcast %132 : vector<16x1xi1> to vector<16x32xi1>
    %134 = arith.select %133, %130, %131 : vector<16x32xi1>, vector<16x32xf32>
    %c0_68 = arith.constant 0 : index
    %c128 = arith.constant 128 : index
    %135 = vector.load %arg7[%c0_68, %c128] : memref<16x160xf32, #tpu.memory_space<vmem>>, vector<16x32xf32>
    tpu.vector_store %arg7[%c0_68, %c128], %134 {strides = array<i32>} : memref<16x160xf32, #tpu.memory_space<vmem>>, vector<16x32xf32>,
    %c0_69 = arith.constant 0 : index
    %c0_70 = arith.constant 0 : index
    %136 = vector.load %arg7[%c0_69, %c0_70] : memref<16x160xf32, #tpu.memory_space<vmem>>, vector<16x160xf32>
    %137 = arith.truncf %136 : vector<16x160xf32> to vector<16x160xbf16>
    %c0_71 = arith.constant 0 : index
    %c0_72 = arith.constant 0 : index
    %138 = vector.load %arg4[%c0_71, %c0_72] : memref<160x2xbf16, #tpu.memory_space<vmem>>, vector<160x2xbf16>
    %cst_73 = arith.constant dense<0.000000e+00> : vector<16x2xf32>
    %139 = tpu.matmul %137, %138, %cst_73 {dimension_numbers = #tpu.dot_dimension_numbers<[1], [0], [0], [1], [0, 0, 1, 1], [], []>} : vector<16x160xbf16>, vector<160x2xbf16>, vector<16x2xf32> -> vector<16x2xf32>
    %140 = vector.broadcast %110 : vector<1x2xf32> to vector<16x2xf32>
    %141 = arith.addf %139, %140 : vector<16x2xf32>
    %c0_74 = arith.constant 0 : index
    %c0_75 = arith.constant 0 : index
    %142 = vector.load %arg6[%c0_74, %c0_75] : memref<16x2xf32, #tpu.memory_space<vmem>>, vector<16x2xf32>
    tpu.vector_store %arg6[%c0_74, %c0_75], %141 {strides = array<i32>} : memref<16x2xf32, #tpu.memory_space<vmem>>, vector<16x2xf32>,
    return
  }
  func.func @transform_0(%arg0: i32) -> (i32, i32) {
    %c0_i32 = arith.constant 0 : i32
    %c0_i32_0 = arith.constant 0 : i32
    return %arg0, %c0_i32 : i32, i32
  }
  func.func @transform_1(%arg0: i32) -> (i32, i32) {
    %c0_i32 = arith.constant 0 : i32
    %c0_i32_0 = arith.constant 0 : i32
    %c0_i32_1 = arith.constant 0 : i32
    return %c0_i32, %c0_i32_0 : i32, i32
  }
  func.func @transform_2(%arg0: i32) -> (i32, i32) {
    %c0_i32 = arith.constant 0 : i32
    %c0_i32_0 = arith.constant 0 : i32
    %c0_i32_1 = arith.constant 0 : i32
    return %c0_i32, %c0_i32_0 : i32, i32
  }
  func.func @transform_3(%arg0: i32) -> (i32, i32) {
    %c0_i32 = arith.constant 0 : i32
    %c0_i32_0 = arith.constant 0 : i32
    %c0_i32_1 = arith.constant 0 : i32
    return %c0_i32, %c0_i32_0 : i32, i32
  }
  func.func @transform_4(%arg0: i32) -> (i32, i32) {
    %c0_i32 = arith.constant 0 : i32
    %c0_i32_0 = arith.constant 0 : i32
    %c0_i32_1 = arith.constant 0 : i32
    return %c0_i32, %c0_i32_0 : i32, i32
  }
  func.func @transform_5(%arg0: i32) -> (i32, i32) {
    %c0_i32 = arith.constant 0 : i32
    %c0_i32_0 = arith.constant 0 : i32
    return %arg0, %c0_i32 : i32, i32
  }
}

</mosaic_0001>

<bundles_post_ra>
// kernel: tpu_custom_call.1
= control target key start
LH: loop header
LB: loop body
LE: loop exit
PB: predicated region body
PF: predicated region fallthrough
CT: control target
= control target key end

     0   :  { %s987_s18 = smov 0   ;;  %s1191_s0 = inlined_call_operand.vmem [shape: f32[32,2], index: 0, kind: input, shape index: {}]   ;;  %s1192_s1 = inlined_call_operand.vmem [shape: bf16[10,32], index: 1, kind: input, shape index: {}]   ;;  %s1193_s2 = inlined_call_operand.vmem [shape: bf16[96,32], index: 2, kind: input, shape index: {}]   ;;  %s1194_s3 = inlined_call_operand.vmem [shape: bf16[160,2], index: 3, kind: input, shape index: {}]   ;;  %s1195_s4 = inlined_call_operand.vmem [shape: f32[3,32], index: 4, kind: input, shape index: {}]   ;;  %s1196_s5 = inlined_call_operand.vmem [shape: f32[32,2], index: 5, kind: output, shape index: {}]  }
   0x1 LB: > { %s839_s19 = sadd.s32 4294967295, %s945_s18   ;;  %p843_p0 = scmp.ge.s32.totalorder %s945_s18, 1  ;;  %s945_s18 = sphi %s987_s18, %s15_s18  }
   0x2   : > { %p188_p1 = scmp.lt.s32.totalorder %s945_s18, 3 }
   0x4   : > { %p189_p2 = pnand %p843_p0, %p188_p1 }
   0x5   : > { %s844_s20 = sshll.u32 (!%p189_p2), %s839_s19, 1  ;;  %s947_s25 = smov (!%p189_p2), 4  }
   0x6   : > { %192 = sbr.rel (%p189_p2) target bundleno = 1020 (0x3fc), region = 40  ;;  %p217_p3 = scmp.lt.s32.totalorder (!%p189_p2), %s844_s20, 3 }
   0x7   : > { %s948_s26 = smov (!%p189_p2), 2   ;;  %s950_s29 = smov (!%p189_p2), 6  }
   0x8   : > { %s952_s30 = smov (!%p189_p2), 8   ;;  %s953_s23 = smov (!%p189_p2), 32  }
   0xb   : > { %v229_v0 = vlaneseq  ;;  %s1198_s20 = smov (!%p217_p3, %s844_s20), 3  ;;  %vm302_vm0 = vcmask 15360   ;;  %v922_v21 = vld [vmem:[%s1192_s1] sm:$0x1f]   ;;  %v949_v29 = vmov 0.0   ;;  %vm400_vm9 = vcmask 1044480  }
   0xc   : > { %s845_s21 = sshll.u32 %s1198_s20, 3  ;;  %882 = vmatprep.subr.bf16.mxu1 %v949_v29  ;;  %v402_v32 = vsel %vm400_vm9, %v922_v21, 0  ;;  %vm951_vm10 = vmmov 0   ;;  %vm324_vm11 = vcmask 31760   ;;  %vm335_vm12 = vcmask 48160   ;;  %v923_v45 = vld [vmem:[%s1193_s2 + $0x28] sm:$0xff]  }
   0xd   : > { %v995_v1 = vshrl.u32 %v229_v0, 7  ;;  %s220_s24 = scalar_lea.vmem %s1191_s0, %s845_s21  ;;  %883 = vmatpush3.bf16.msra.mxu1 %v402_v32  ;;  %884 = vmatprep.mubr.msk.bf16.mxu1 %vm951_vm10, %v949_v29  ;;  %vm357_vm13 = vcmask 64560   ;;  %vm379_vm14 = vcmask 80960   ;;  %vm396_vm15 = vcmask 80896   ;;  %v924_v46 = vld [vmem:[%s1193_s2 + $0x20] sm:$0xff]   ;;  %v925_v47 = vld [vmem:[%s1193_s2 + $0x18] sm:$0xff]  }
   0xe   : > { %v288_v6 = vld [vmem:[%s220_s24] sm:$0xff]  ;;  %v289_v7 = vld [vmem:[%s220_s24 + $0x8] sm:$0xff]  ;;  %888 = vmatprep.subr.bf16.mxu1 %v949_v29  ;;  %v926_v48 = vld [vmem:[%s1193_s2 + $0x10] sm:$0xff]   ;;  %vm454_vm9 = vcmask 261120   ;;  %s954_s24 = smov 64  }
   0xf   : > { %v231_v2 = vadd.s32 8, %v995_v1  ;;  %v236_v3 = vand.u32 15, %v995_v1  ;;  %vm307_vm1 = vcmp.lt.s32.totalorder %v995_v1, 1  ;;  %vm340_vm2 = vcmp.lt.s32.totalorder %v995_v1, 7  ;;  %329 = vrot.lane.b32.xlu1 %v288_v6, %s947_s25  ;;  %v848_v49 = vld [vmem:[%s1195_s4] ss:$0 sm:$0xff] }
  0x10   : > { %v305_v9 = vrot.slane %v288_v6, 7  ;;  %v306_v10 = vrot.slane %v289_v7, 7  ;;  %v338_v11 = vrot.slane %v288_v6, 1  ;;  %v339_v12 = vrot.slane %v289_v7, 1  ;;  %v927_v51 = vld [vmem:[%s1193_s2 + $0x8] sm:$0xff]   ;;  %v928_v55 = vld [vmem:[%s1193_s2] sm:$0xff]  }
  0x11   : > { %v243_v4 = vand.u32 15, %v231_v2  ;;  %v1008_v5 = vadd.s32 4294967295, %v236_v3  ;;  %v1011_v8 = vadd.s32 4294967294, %v236_v3  ;;  %v360_v15 = vrot.slane %v288_v6, 2  ;;  %v931_v21 = vld [vmem:[%s1194_s3 + $0x28] sm:$0xff]  }
  0x12   : > { %vm362_vm3 = vcmp.lt.s32.totalorder %v995_v1, 6  ;;  %v308_v16 = vsel %vm307_vm1, %v305_v9, %v306_v10  ;;  %v342_v17 = vsel %vm340_vm2, %v339_v12, %v338_v11  ;;  %vm293_vm5 = vcmp.lt.s32.totalorder %v995_v1, 2 }
  0x13   : > { %v1013_v13 = vadd.s32 1, %v243_v4  ;;  %v1015_v14 = vadd.s32 2, %v243_v4  ;;  %vm266_vm4 = vcmp.ge.s32.totalorder %v1008_v5, 0  ;;  %320 = vrot.lane.b32.xlu0 %v308_v16, %s948_s26  ;;  %v341_v18 = vsel %vm340_vm2, %v338_v11, %v339_v12  ;;  %331 = vrot.lane.b32.xlu1 %v289_v7, %s947_s25 }
  0x14   : > { %v309_v19 = vsel %vm307_vm1, %v306_v10, %v305_v9  ;;  %v361_v20 = vrot.slane %v289_v7, 2  ;;  %v292_v22 = vrot.slane %v289_v7, 6  ;;  %v291_v23 = vrot.slane %v288_v6, 6 }
  0x15   : > { %vm277_vm6 = vcmp.lt.s32.totalorder %v1013_v13, 16  ;;  %vm285_vm7 = vcmp.lt.s32.totalorder %v1015_v14, 16  ;;  %vm258_vm8 = vcmp.ge.s32.totalorder %v1011_v8, 0  ;;  %v314_v26 = vsel %vm266_vm4, %v309_v19, 0.0 }
  0x16   : > { %v348_v24 = vsel %vm277_vm6, %v342_v17, 0.0  ;;  %v364_v25 = vsel %vm362_vm3, %v361_v20, %v360_v15  ;;  %v294_v27 = vsel %vm293_vm5, %v291_v23, %v292_v22  ;;  %v295_v28 = vsel %vm293_vm5, %v292_v22, %v291_v23  ;;  %v932_v22 = vld [vmem:[%s1194_s3 + $0x20] sm:$0xff]   ;;  %v933_v23 = vld [vmem:[%s1194_s3 + $0x18] sm:$0xff]  }
  0x17   : > { %351 = vrot.lane.b32.xlu0 %v341_v18, %s950_s29  ;;  %v370_v30 = vsel %vm285_vm7, %v364_v25, 0.0  ;;  %304 = vst.msk [vmem:[#allocation2 + $0x10] sm:$0xff] %vm302_vm0, %v294_v27  ;;  %v300_v31 = vsel %vm258_vm8, %v295_v28, 0.0  ;;  %353 = vrot.lane.b32.xlu1 %v348_v24, %s950_s29  ;;  %v363_v33 = vsel %vm362_vm3, %v360_v15, %v361_v20  ;;  %v929_v18 = vld [vmem:[%s1194_s3 + $0x38] sm:$0xff]   ;;  %v955_v19 = vmov 0   ;;  %v930_v20 = vld [vmem:[%s1194_s3 + $0x30] sm:$0xff]  }
  0x18   : > { %303 = vst.msk [vmem:[#allocation2] sm:$0xff] %vm302_vm0, %v300_v31  ;;  %740 = vmatprep.subr.bf16.mxu0 %v955_v19  ;;  %v934_v24 = vld [vmem:[%s1194_s3 + $0x10] sm:$0xff]   ;;  %v935_v25 = vld [vmem:[%s1194_s3 + $0x8] sm:$0xff]  }
  0x19   : > { %741 = vmatpush1.bf16.msra.mxu0 %v929_v18 }
  0x1a   : > { %742 = vmatprep.subr.bf16.mxu0 %v955_v19 }
  0x1b   : > { %318 = vrot.lane.b32.xlu0 %v314_v26, %s948_s26  ;;  %375 = vrot.lane.b32.xlu1 %v370_v30, %s952_s30  ;;  %v851_v26 = vld [vmem:[%s1195_s4 + $0x1] ss:$0 sm:$0xff] }
  0x1d   : > { %743 = vmatpush1.bf16.msra.mxu0 %v930_v20 }
  0x1e   : > { %744 = vmatprep.subr.bf16.mxu0 %v955_v19 }
  0x1f   : > { %373 = vrot.lane.b32.xlu0 %v363_v33, %s952_s30  ;;  %v937_v33 = vld [vmem:[%s1194_s3 + $0x48] sm:$0xff]   ;;  %s226_s30 = scalar_lea.vmem %s1196_s5, %s845_s21 }
  0x21   : > { %745 = vmatpush1.bf16.msra.mxu0 %v931_v21 }
  0x22   : > { %746 = vmatprep.subr.bf16.mxu0 %v955_v19 }
  0x25   : > { %747 = vmatpush1.bf16.msra.mxu0 %v932_v22 }
  0x26   : > { %748 = vmatprep.subr.bf16.mxu0 %v955_v19 }
  0x29   : > { %749 = vmatpush1.bf16.msra.mxu0 %v933_v23 }
  0x2a   : > { %750 = vmatprep.subr.bf16.mxu0 %v955_v19 }
  0x2d   : > { %751 = vmatpush1.bf16.msra.mxu0 %v934_v24 }
  0x2e   : > { %752 = vmatprep.subr.bf16.mxu0 %v955_v19 }
  0x31   : > { %753 = vmatpush1.bf16.msra.mxu0 %v935_v25 }
  0x32   : > { %754 = vmatprep.subr.bf16.mxu0 %v955_v19 }
  0x81   : > { %v330_v34 = vpop.permute.xlu1 %329 }
  0x85   : > { %v321_v35 = vpop.permute.xlu0 %320  ;;  %v332_v36 = vpop.permute.xlu1 %331 }
  0x86   : > { %326 = vst.msk [vmem:[#allocation2 + $0x10] sm:$0xff] %vm324_vm11, %v321_v35 }
  0x87   : > { %337 = vst.msk [vmem:[#allocation2 + $0x10] sm:$0xff] %vm335_vm12, %v332_v36 }
  0x89   : > { %v352_v37 = vpop.permute.xlu0 %351  ;;  %v354_v38 = vpop.permute.xlu1 %353 }
  0x8a   : > { %359 = vst.msk [vmem:[#allocation2 + $0x10] sm:$0xff] %vm357_vm13, %v354_v38 }
  0x8d   : > { %v319_v39 = vpop.permute.xlu0 %318  ;;  %v376_v40 = vpop.permute.xlu1 %375 }
  0x8e   : > { %325 = vst.msk [vmem:[#allocation2] sm:$0xff] %vm324_vm11, %v319_v39  ;;  %vm482_vm11 = vcmask 785920  }
  0x8f   : > { %336 = vst.msk [vmem:[#allocation2] sm:$0xff] %vm335_vm12, %v330_v34  ;;  %vm540_vm12 = vcmask 785408  }
  0x90   : > { %381 = vst.msk [vmem:[#allocation2 + $0x10] sm:$0xff] %vm379_vm14, %v376_v40 }
  0x91   : > { %358 = vst.msk [vmem:[#allocation2] sm:$0xff] %vm357_vm13, %v352_v37  ;;  %v374_v41 = vpop.permute.xlu0 %373  ;;  %v938_v37 = vld [vmem:[%s1194_s3 + $0x40] sm:$0xff]  }
  0x92   : > { %380 = vst.msk [vmem:[#allocation2] sm:$0xff] %vm379_vm14, %v374_v41 }
  0x97   : > { %v383_v42 = vld [vmem:[#allocation2 + $0x10] sm:$0xff] }
  0x99   : > { %v382_v43 = vld [vmem:[#allocation2] sm:$0xff] }
  0x9a   : > { %v384_v44 = vpack.c.bf16 %v383_v42, %v382_v43 }
  0x9c   : > { %885 = vmatmul.mubr.msk.bf16.vlgmr.msra.gmra.mxu1 %vm396_vm15, %v384_v44 }
  0x9d   : > { %900 = vmatprep.mubr.msk.bf16.mxu1 %vm951_vm10, %v949_v29  ;;  %889 = vmatpush3.bf16.msra.mxu1 %v923_v45  ;;  %vm465_vm10 = vcmask 523520  }
  0x9e   : > { %890 = vmatprep.subr.bf16.mxu1 %v949_v29 }
  0xa1   : > { %891 = vmatpush3.bf16.msra.mxu1 %v924_v46 }
  0xa2   : > { %892 = vmatprep.subr.bf16.mxu1 %v949_v29 }
  0xa5   : > { %893 = vmatpush3.bf16.msra.mxu1 %v925_v47 }
  0xa6   : > { %894 = vmatprep.subr.bf16.mxu1 %v949_v29 }
  0xa9   : > { %895 = vmatpush3.bf16.msra.mxu1 %v926_v48 }
  0xaa   : > { %896 = vmatprep.subr.bf16.mxu1 %v949_v29 }
  0xad   : > { %897 = vmatpush3.bf16.msra.mxu1 %v927_v51 }
  0xae   : > { %898 = vmatprep.subr.bf16.mxu1 %v949_v29  ;;  %v936_v29 = vld [vmem:[%s1194_s3] sm:$0xff]  }
  0xaf   : > { %755 = vmatpush1.bf16.msra.mxu0 %v936_v29 }
  0xb0   : > { %768 = vmatprep.subr.bf16.mxu0 %v955_v19 }
  0xb1   : > { %899 = vmatpush3.bf16.msra.mxu1 %v928_v55 }
  0xb3   : > { %769 = vmatpush2.bf16.msra.mxu0 %v937_v33 }
  0xb4   : > { %770 = vmatprep.subr.bf16.mxu0 %v955_v19 }
  0xb7   : > { %771 = vmatpush2.bf16.msra.mxu0 %v938_v37 }
 0x15c   : > { %v438_v50 = vpop.f32.mrf.mxu1 }
 0x15d   : > { %v439_v52 = vadd.f32 %v848_v49, %v438_v50 }
 0x15e   : > { %v886_v53 = vpop.f32.mrf.mxu1 }
 0x15f   : > { %v445_v54 = vmax.f32 %v439_v52, 0.0 }
 0x160   : > { %v441_v56 = vpop.f32.mrf.mxu1 }
 0x161   : > { %v442_v57 = vadd.f32 %v848_v49, %v441_v56  ;;  %459 = vrot.lane.b32.xlu0 %v445_v54, %s953_s23  ;;  %v448_v60 = vrot.slane %v445_v54, 7  ;;  %v468_v61 = vrot.slane %v445_v54, 1 }
 0x162   : > { %v887_v58 = vpop.f32.mrf.mxu1 }
 0x163   : > { %v446_v59 = vmax.f32 %v442_v57, 0.0 }
 0x165   : > { %v449_v62 = vrot.slane %v446_v59, 7  ;;  %v469_v63 = vrot.slane %v446_v59, 1  ;;  %461 = vrot.lane.b32.xlu1 %v446_v59, %s953_s23 }
 0x167   : > { %v470_v0 = vsel %vm340_vm2, %v468_v61, %v469_v63  ;;  %v471_v2 = vsel %vm340_vm2, %v469_v63, %v468_v61  ;;  %v451_v3 = vsel %vm307_vm1, %v449_v62, %v448_v60  ;;  %v450_v4 = vsel %vm307_vm1, %v448_v60, %v449_v62 }
 0x168   : > { %476 = vrot.lane.b32.xlu0 %v470_v0, %s954_s24  ;;  %v473_v6 = vsel %vm277_vm6, %v471_v2, 0.0  ;;  %v452_v7 = vsel %vm266_vm4, %v451_v3, 0.0  ;;  %456 = vst.msk [vmem:[#allocation2 + $0x10] sm:$0xff] %vm454_vm9, %v450_v4  ;;  %v859_v2 = vld [vmem:[%s1195_s4 + $0x2] ss:$0 sm:$0xff] }
 0x169   : > { %478 = vrot.lane.b32.xlu1 %v473_v6, %s954_s24  ;;  %455 = vst.msk [vmem:[#allocation2] sm:$0xff] %vm454_vm9, %v452_v7 }
 0x1d3   : > { %v460_v9 = vpop.permute.xlu0 %459 }
 0x1d4   : > { %466 = vst.msk [vmem:[#allocation2] sm:$0xff] %vm465_vm10, %v460_v9 }
 0x1d7   : > { %v462_v10 = vpop.permute.xlu1 %461 }
 0x1d8   : > { %467 = vst.msk [vmem:[#allocation2 + $0x10] sm:$0xff] %vm465_vm10, %v462_v10 }
 0x1da   : > { %v477_v11 = vpop.permute.xlu0 %476 }
 0x1db   : > { %483 = vst.msk [vmem:[#allocation2] sm:$0xff] %vm482_vm11, %v477_v11  ;;  %v479_v12 = vpop.permute.xlu1 %478 }
 0x1dc   : > { %484 = vst.msk [vmem:[#allocation2 + $0x10] sm:$0xff] %vm482_vm11, %v479_v12 }
 0x1e2   : > { %v485_v15 = vld [vmem:[#allocation2] sm:$0xff] }
 0x1e3   : > { %v486_v16 = vld [vmem:[#allocation2 + $0x10] sm:$0xff] }
 0x1e4   : > { %v487_v17 = vpack.c.bf16 %v486_v16, %v485_v15 }
 0x1e6   : > { %901 = vmatmul.mubr.msk.bf16.vlgmr.msra.gmra.mxu1 %vm540_vm12, %v487_v17 }
 0x2a6   : > { %v578_v27 = vpop.f32.mrf.mxu1 }
 0x2a7   : > { %v579_v28 = vadd.f32 %v851_v26, %v578_v27 }
 0x2a8   : > { %v902_v30 = vpop.f32.mrf.mxu1 }
 0x2a9   : > { %v585_v31 = vmax.f32 %v579_v28, 0.0 }
 0x2aa   : > { %v581_v32 = vpop.f32.mrf.mxu1 }
 0x2ab   : > { %v582_v34 = vadd.f32 %v851_v26, %v581_v32  ;;  %614 = vrot.lane.b32.xlu0 %v585_v31, %s954_s24  ;;  %v639_v38 = vrot.slane %v585_v31, 2  ;;  %v596_v39 = vrot.slane %v585_v31, 7  ;;  %v622_v44 = vrot.slane %v585_v31, 1 }
 0x2ac   : > { %v903_v35 = vpop.f32.mrf.mxu1  ;;  %v588_v45 = vrot.slane %v585_v31, 6 }
 0x2ad   : > { %v586_v36 = vmax.f32 %v582_v34, 0.0 }
 0x2af   : > { %v640_v40 = vrot.slane %v586_v36, 2  ;;  %616 = vrot.lane.b32.xlu1 %v586_v36, %s954_s24  ;;  %v597_v41 = vrot.slane %v586_v36, 7  ;;  %v623_v42 = vrot.slane %v586_v36, 1  ;;  %v589_v43 = vrot.slane %v586_v36, 6 }
 0x2b1   : > { %v641_v46 = vsel %vm362_vm3, %v639_v38, %v640_v40  ;;  %v642_v47 = vsel %vm362_vm3, %v640_v40, %v639_v38  ;;  %v599_v48 = vsel %vm307_vm1, %v597_v41, %v596_v39  ;;  %v598_v49 = vsel %vm307_vm1, %v596_v39, %v597_v41 }
 0x2b2   : > { %v644_v50 = vsel %vm285_vm7, %v642_v47, 0.0  ;;  %645 = vst.msk [vmem:[#allocation2 + $0x8] sm:$0xff] %vm454_vm9, %v641_v46  ;;  %v600_v51 = vsel %vm266_vm4, %v599_v48, 0.0  ;;  %v625_v52 = vsel %vm340_vm2, %v623_v42, %v622_v44  ;;  %v591_v53 = vsel %vm293_vm5, %v589_v43, %v588_v45 }
 0x2b3   : > { %646 = vst.msk [vmem:[#allocation2 + $0x18] sm:$0xff] %vm454_vm9, %v644_v50  ;;  %604 = vrot.lane.b32.xlu0 %v600_v51, %s953_s23  ;;  %606 = vrot.lane.b32.xlu1 %v598_v49, %s953_s23  ;;  %v590_v14 = vsel %vm293_vm5, %v588_v45, %v589_v43  ;;  %v592_v54 = vsel %vm258_vm8, %v591_v53, 0.0  ;;  %v624_v5 = vsel %vm340_vm2, %v622_v44, %v623_v42  ;;  %v627_v55 = vsel %vm277_vm6, %v625_v52, 0.0  ;;  %s956_s23 = smov 96  }
 0x2b4   : > { %595 = vst.msk [vmem:[#allocation2 + $0x10] sm:$0xff] %vm454_vm9, %v590_v14  ;;  %594 = vst.msk [vmem:[#allocation2] sm:$0xff] %vm454_vm9, %v592_v54  ;;  %vm636_vm1 = vcmask 1048320  }
 0x2b7   : > { %630 = vrot.lane.b32.xlu0 %v624_v5, %s956_s23  ;;  %632 = vrot.lane.b32.xlu1 %v627_v55, %s956_s23 }
 0x2b9   : > { %v648_v56 = vld [vmem:[#allocation2 + $0x8] sm:$0xff] }
 0x2ba   : > { %v650_v57 = vld [vmem:[#allocation2 + $0x18] sm:$0xff] }
 0x2bb   : > { %v652_v58 = vpack.c.bf16 %v650_v57, %v648_v56 }
 0x2bd   : > { %870 = vmatprep.mubr.msk.bf16.mxu0 %vm454_vm9, %v652_v58 }
 0x31d   : > { %v615_v8 = vpop.permute.xlu0 %614 }
 0x321   : > { %v617_v59 = vpop.permute.xlu1 %616 }
 0x325   : > { %v605_v60 = vpop.permute.xlu0 %604  ;;  %v607_v61 = vpop.permute.xlu1 %606 }
 0x326   : > { %610 = vst.msk [vmem:[#allocation2] sm:$0xff] %vm465_vm10, %v605_v60  ;;  %611 = vst.msk [vmem:[#allocation2 + $0x10] sm:$0xff] %vm465_vm10, %v607_v61 }
 0x327   : > { %620 = vst.msk [vmem:[#allocation2] sm:$0xff] %vm482_vm11, %v615_v8  ;;  %621 = vst.msk [vmem:[#allocation2 + $0x10] sm:$0xff] %vm482_vm11, %v617_v59 }
 0x329   : > { %v631_v1 = vpop.permute.xlu0 %630  ;;  %v633_v13 = vpop.permute.xlu1 %632 }
 0x32a   : > { %637 = vst.msk [vmem:[#allocation2] sm:$0xff] %vm636_vm1, %v631_v1  ;;  %638 = vst.msk [vmem:[#allocation2 + $0x10] sm:$0xff] %vm636_vm1, %v633_v13 }
 0x331   : > { %v647_v62 = vld [vmem:[#allocation2] sm:$0xff]  ;;  %v649_v63 = vld [vmem:[#allocation2 + $0x10] sm:$0xff] }
 0x332   : > { %v651_v0 = vpack.c.bf16 %v649_v63, %v647_v62 }
 0x334   : > { %773 = vmatmul.mubr.bf16.vlgmr.msra.gmra.mxu0 %v651_v0 }
 0x3f4   : > { %v774_v3 = vpop.f32.mrf.mxu0 }
 0x3f5   : > { %v775_v4 = vadd.f32 %v859_v2, %v774_v3 }
 0x3f6   : > { %v776_v6 = vpop.f32.mrf.mxu0 }
 0x3f7   : > { %781 = vst.msk [vmem:[%s226_s30] sm:$0xff] %vm302_vm0, %v775_v4 }
 0x3f8   : > { %v777_v7 = vpop.f32.mrf.mxu0 }
 0x3f9   : > { %v778_v9 = vadd.f32 %v859_v2, %v777_v7 }
 0x3fa   : > { %v779_v10 = vpop.f32.mrf.mxu0 }
 0x3fb   : > { %782 = vst.msk [vmem:[%s226_s30 + $0x8] sm:$0xff] %vm302_vm0, %v778_v9 }
 0x3fc PF: > { %s15_s18 = sadd.s32 1, %s945_s18  }
 0x3fd   : > { %p12_p4 = scmp.ge.s32.totalorder %s15_s18, 4  }
 0x3ff   :  { %14 = sbr.rel (!%p12_p4) target bundleno = 1 (0x1), region = 70 }

</bundles_post_ra>
